<compile_context>
chip_gen: v7x
topology: tpu7x:2x2x1
jax: 0.10.0
libtpu: 0.0.40
codegen_flags: <defaults>
</compile_context>

<pallas_src>
import jax
import jax.numpy as jnp
from jax import lax
from jax.experimental import pallas as pl
from jax.experimental.pallas import tpu as pltpu


# --------------------------------------------------------------------------
# Wrapper-side weight preprocessing (tiny, one-time)
# --------------------------------------------------------------------------
def _stacked_band_matrix(w_hwio, W, bn_scale, mxu_dtype):
    """Fold the kw taps + W-direction zero padding of a 3x3 conv AND the BN
    per-output-channel scale into ONE stacked (3*W*Cin, W*Cout) matrix.

    Row-block kh holds  B[kh][w*Cin + ci, w2*Cout + co]
        = w_hwio[kh, w - w2 + 1, ci, co] * bn_scale[co]
    and 0 outside the |w - w2| <= 1 band (== the conv's zero padding along W).
    The kernel multiplies it by an LHS built as concat([row h-1, row h, row h+1]).
    """
    KH, KW, Cin, Cout = w_hwio.shape
    w_idx = jnp.arange(W)
    kw = w_idx[:, None] - w_idx[None, :] + 1                   # (W, W): w - w2 + 1
    valid = (kw >= 0) & (kw <= KW - 1)
    kw_c = jnp.clip(kw, 0, KW - 1)
    taps = w_hwio[:, kw_c, :, :]                               # (KH, W, W, Cin, Cout)
    taps = jnp.where(valid[None, :, :, None, None], taps, 0.0)
    band = jnp.transpose(taps, (0, 1, 3, 2, 4)).reshape(KH, W * Cin, W * Cout)
    band = band * jnp.tile(bn_scale, W)[None, None, :]         # fold BN scale (free)
    return band.reshape(KH * W * Cin, W * Cout).astype(mxu_dtype)


# --------------------------------------------------------------------------
# Kernel
# --------------------------------------------------------------------------
def _make_kernel(nb, H, WC, mxu_dtype, out_dtype):
    M = nb * H  # rows processed per grid step (H=16 -> multiple of 8)

    def kernel(x_ref, w1_ref, c1_ref, w2_ref, c2_ref, o_ref):
        # (nb, H, WC) -> (M, WC): merges leading dims only (layout no-op).
        x = x_ref[...].reshape(M, WC)

        # Per-image vertical boundary masks: O(M) iota work per step (negligible).
        row = lax.broadcasted_iota(jnp.int32, (M, 1), 0)
        h = row % H
        mask_top = (h != 0).astype(jnp.float32)      # no row h-1 at each image's top
        mask_bot = (h != H - 1).astype(jnp.float32)  # no row h+1 at each image's bottom

        def conv3x3_bn(inp, w_ref):
            # kh = 0 / 2 taps: sublane rotation on the XLU (off the MXU/VALU
            # critical path) + mask = the H-direction zero padding of the conv.
            x_prev = pltpu.roll(inp, 1, 0) * mask_top        # row h-1 (0 at top)
            x_next = pltpu.roll(inp, M - 1, 0) * mask_bot    # row h+1 (0 at bottom)
            # Lane-aligned concat -> single K-stacked matmul (K = 3*WC = 384).
            lhs = jnp.concatenate([x_prev, inp, x_next], axis=1)
            return jnp.dot(lhs.astype(mxu_dtype), w_ref[...],
                           preferred_element_type=jnp.float32)

        # conv1 (bn1 scale folded into weights) -> +bias -> relu
        h1 = jnp.maximum(conv3x3_bn(x, w1_ref) + c1_ref[...], 0.0)
        # conv2 (bn2 scale folded) -> +bias -> +identity -> relu
        y = jnp.maximum(conv3x3_bn(h1, w2_ref) + c2_ref[...] + x, 0.0)
        o_ref[...] = y.astype(out_dtype).reshape(nb, H, WC)

    return kernel


# --------------------------------------------------------------------------
# Callers
# --------------------------------------------------------------------------
def _auto_images_per_step(N, cap=64):
    """Largest divisor of N that is <= cap while keeping >= 2 grid steps
    (so both v7x TensorCores get a 'parallel' step); falls back to N."""
    best = None
    for d in range(1, min(N, cap) + 1):
        if N % d == 0 and N // d >= 2:
            best = d
    return best if best is not None else N


def basic_block_pallas_nhwc(x_nhwc, w1_hwio, s1, b1, w2_hwio, s2, b2,
                            *, images_per_step=None,
                            mxu_dtype=jnp.bfloat16, out_dtype=None):
    """NHWC end-to-end entry point.  x_nhwc: (N, H, W, C) float32.

    images_per_step: images per grid step (default: auto, <=64 images and >=2
        'parallel' steps when the batch allows - keeps per-step VMEM ~2 MiB
        and gives double-buffered DMA/compute overlap + 2-TC use on v7x).
    mxu_dtype: MXU operand dtype (default bf16, f32 accumulation).  Use
        jnp.float32 for the exact path.
    out_dtype: output dtype (default: input dtype); bf16 halves output HBM traffic.
    """
    N, H, W, C = x_nhwc.shape
    WC = W * C
    assert WC % 128 == 0, "banded-weight path needs W*C to be a multiple of 128"
    # TODO(synk): for real ResNet widths (WC >> 128) switch to a K=9*C im2col
    #             matmul with channel tiling instead of the O(WC^2) band matrices.
    if out_dtype is None:
        out_dtype = x_nhwc.dtype
    if images_per_step is None:
        images_per_step = _auto_images_per_step(N)
    nb = images_per_step
    assert N % nb == 0, "images_per_step must divide the batch"
    grid = (N // nb,)

    x_flat = x_nhwc.reshape(N, H, WC)                          # trailing-dim merge (free)
    W1 = _stacked_band_matrix(w1_hwio, W, s1, mxu_dtype)       # (3*WC, WC)
    W2 = _stacked_band_matrix(w2_hwio, W, s2, mxu_dtype)
    c1f = jnp.tile(b1, W).reshape(1, WC).astype(jnp.float32)   # per-lane BN bias
    c2f = jnp.tile(b2, W).reshape(1, WC).astype(jnp.float32)

    kernel = _make_kernel(nb, H, WC, mxu_dtype, out_dtype)
    rep2 = lambda g: (0, 0)

    w_bytes = jnp.dtype(mxu_dtype).itemsize
    bytes_accessed = int(N * H * WC * (4 + jnp.dtype(out_dtype).itemsize)
                         + 2 * 3 * WC * WC * w_bytes + 2 * WC * 4)
    flops = int(2 * 2 * N * H * (3 * WC) * WC)                 # 2 convs, K=3*WC

    out_flat = pl.pallas_call(
        kernel,
        out_shape=jax.ShapeDtypeStruct((N, H, WC), out_dtype),
        grid=grid,
        in_specs=[
            pl.BlockSpec((nb, H, WC), lambda g: (g, 0, 0)),    # x (lane-dense)
            pl.BlockSpec((3 * WC, WC), rep2),                  # conv1+bn1 stacked weights
            pl.BlockSpec((1, WC), rep2),                       # bn1 bias
            pl.BlockSpec((3 * WC, WC), rep2),                  # conv2+bn2 stacked weights
            pl.BlockSpec((1, WC), rep2),                       # bn2 bias
        ],
        out_specs=pl.BlockSpec((nb, H, WC), lambda g: (g, 0, 0)),
        compiler_params=pltpu.CompilerParams(
            dimension_semantics=("parallel",)),
        cost_estimate=pl.CostEstimate(
            flops=flops, transcendentals=0, bytes_accessed=bytes_accessed),
    )(x_flat, W1, c1f, W2, c2f)

    return out_flat.reshape(N, H, W, C)


def basic_block_pallas(x_nchw, w1_hwio, s1, b1, w2_hwio, s2, b2, **kw):
    """NCHW (PyTorch-layout) wrapper.  In an NHWC pipeline call
    basic_block_pallas_nhwc directly and skip both boundary transposes
    (each one is a full extra HBM read+write of the tensor)."""
    x_nhwc = jnp.transpose(x_nchw, (0, 2, 3, 1))
    y = basic_block_pallas_nhwc(x_nhwc, w1_hwio, s1, b1, w2_hwio, s2, b2, **kw)
    return jnp.transpose(y, (0, 3, 1, 2)).astype(x_nchw.dtype)


# ---------------------------- reference (plain JAX) ----------------------------
def _ref_conv3x3_nhwc(x_nhwc, w_hwio):
    return lax.conv_general_dilated(
        x_nhwc, w_hwio, window_strides=(1, 1), padding=((1, 1), (1, 1)),
        dimension_numbers=('NHWC', 'HWIO', 'NHWC'))


def basic_block_ref(x_nchw, w1_hwio, s1, b1, w2_hwio, s2, b2):
    x = jnp.transpose(x_nchw, (0, 2, 3, 1))
    h = jnp.maximum(_ref_conv3x3_nhwc(x, w1_hwio) * s1 + b1, 0.0)
    h = _ref_conv3x3_nhwc(h, w2_hwio) * s2 + b2
    h = jnp.maximum(h + x, 0.0)
    return jnp.transpose(h, (0, 3, 1, 2))


if __name__ == "__main__":
    # BasicBlock(inplanes=8, planes=8, stride=1, downsample=None); W*C = 128.
    N, C, H, W = 2, 8, 16, 16
    eps = 1e-5

    key = jax.random.PRNGKey(0)
    kx, kw1, kw2, kg1, kb1, km1, kv1, kg2, kb2, km2, kv2 = jax.random.split(key, 11)

    x = jax.random.normal(kx, (N, C, H, W), jnp.float32)           # NCHW input
    w1 = jax.random.normal(kw1, (3, 3, C, C), jnp.float32) * 0.1   # HWIO conv weights
    w2 = jax.random.normal(kw2, (3, 3, C, C), jnp.float32) * 0.1

    # BatchNorm (inference): fold (gamma, beta, running_mean, running_var).
    gamma1 = 1.0 + 0.1 * jax.random.normal(kg1, (C,), jnp.float32)
    beta1 = 0.1 * jax.random.normal(kb1, (C,), jnp.float32)
    mean1 = 0.1 * jax.random.normal(km1, (C,), jnp.float32)
    var1 = jnp.abs(jax.random.normal(kv1, (C,), jnp.float32)) + 0.5
    gamma2 = 1.0 + 0.1 * jax.random.normal(kg2, (C,), jnp.float32)
    beta2 = 0.1 * jax.random.normal(kb2, (C,), jnp.float32)
    mean2 = 0.1 * jax.random.normal(km2, (C,), jnp.float32)
    var2 = jnp.abs(jax.random.normal(kv2, (C,), jnp.float32)) + 0.5

    s1 = gamma1 / jnp.sqrt(var1 + eps)
    b1 = beta1 - mean1 * s1
    s2 = gamma2 / jnp.sqrt(var2 + eps)
    b2 = beta2 - mean2 * s2

    ref = basic_block_ref(x, w1, s1, b1, w2, s2, b2)

    # Default config: bf16 MXU operands, auto multi-step 'parallel' grid
    # (N=2 -> 2 grid steps, so both v7x TensorCores would get work).
    out = jax.block_until_ready(basic_block_pallas(x, w1, s1, b1, w2, s2, b2))
    assert out.shape == (N, C, H, W)
    assert jnp.allclose(out, ref, atol=5e-2, rtol=5e-2), "mismatch (bf16 path)"

    # Exact path: f32 MXU operands, single grid step over the whole batch.
    out_f32 = jax.block_until_ready(
        basic_block_pallas(x, w1, s1, b1, w2, s2, b2,
                           images_per_step=N, mxu_dtype=jnp.float32))
    assert jnp.allclose(out_f32, ref, atol=1e-4, rtol=1e-4), "mismatch (f32 path)"

    print("KERNEL_OK")
</pallas_src>

<mosaic_0001>
module attributes {stable_mosaic.version = 11 : i64} {
  func.func @kernel(%arg0: i32, %arg1: memref<1x16x128xf32, #tpu.memory_space<vmem>>, %arg2: memref<384x128xbf16, #tpu.memory_space<vmem>>, %arg3: memref<1x128xf32, #tpu.memory_space<vmem>>, %arg4: memref<384x128xbf16, #tpu.memory_space<vmem>>, %arg5: memref<1x128xf32, #tpu.memory_space<vmem>>, %arg6: memref<1x16x128xf32, #tpu.memory_space<vmem>>) attributes {dimension_semantics = [#tpu.dimension_semantics<parallel>], iteration_bounds = array<i64: 2>, scalar_prefetch = 0 : i64, scratch_operands = 0 : i64, tpu.core_type = #tpu.core_type<tc>, window_params = [{transform_indices = @transform_0, window_bounds = array<i64: 1, 16, 128>}, {pipeline_mode = #tpu.pipeline_mode<synchronous>, transform_indices = @transform_1, window_bounds = array<i64: 384, 128>}, {pipeline_mode = #tpu.pipeline_mode<synchronous>, transform_indices = @transform_2, window_bounds = array<i64: 1, 128>}, {pipeline_mode = #tpu.pipeline_mode<synchronous>, transform_indices = @transform_3, window_bounds = array<i64: 384, 128>}, {pipeline_mode = #tpu.pipeline_mode<synchronous>, transform_indices = @transform_4, window_bounds = array<i64: 1, 128>}, {transform_indices = @transform_5, window_bounds = array<i64: 1, 16, 128>}]} {
    %c0 = arith.constant 0 : index
    %c0_0 = arith.constant 0 : index
    %c0_1 = arith.constant 0 : index
    %0 = vector.load %arg1[%c0, %c0_0, %c0_1] : memref<1x16x128xf32, #tpu.memory_space<vmem>>, vector<1x16x128xf32>
    %1 = vector.shape_cast %0 : vector<1x16x128xf32> to vector<16x128xf32>
    %2 = tpu.iota {dimensions = array<i32: 0>} : vector<16x1xi32>
    %c16_i32 = arith.constant 16 : i32
    %c0_i32 = arith.constant 0 : i32
    %3 = arith.cmpi eq, %c16_i32, %c0_i32 : i32
    %c1_i32 = arith.constant 1 : i32
    %4 = arith.select %3, %c1_i32, %c16_i32 : i32
    %5 = vector.broadcast %4 : i32 to vector<16x1xi32>
    %6 = arith.remsi %2, %5 : vector<16x1xi32>
    %c0_i32_2 = arith.constant 0 : i32
    %7 = vector.broadcast %c0_i32_2 : i32 to vector<16x1xi32>
    %8 = arith.cmpi ne, %6, %7 : vector<16x1xi32>
    %c0_i32_3 = arith.constant 0 : i32
    %9 = vector.broadcast %c0_i32_3 : i32 to vector<16x1xi32>
    %10 = arith.cmpi slt, %6, %9 : vector<16x1xi32>
    %c0_i32_4 = arith.constant 0 : i32
    %11 = arith.cmpi slt, %4, %c0_i32_4 : i32
    %12 = vector.broadcast %11 : i1 to vector<16x1xi1>
    %13 = vector.broadcast %12 : vector<16x1xi1> to vector<16x1xi1>
    %14 = arith.xori %10, %13 : vector<16x1xi1>
    %15 = arith.andi %14, %8 : vector<16x1xi1>
    %16 = vector.broadcast %4 : i32 to vector<16x1xi32>
    %17 = arith.addi %6, %16 : vector<16x1xi32>
    %18 = arith.select %15, %17, %6 : vector<16x1xi1>, vector<16x1xi32>
    %c0_i32_5 = arith.constant 0 : i32
    %19 = vector.broadcast %c0_i32_5 : i32 to vector<16x1xi32>
    %20 = arith.cmpi ne, %18, %19 : vector<16x1xi32>
    %21 = arith.extui %20 : vector<16x1xi1> to vector<16x1xi32>
    %22 = arith.sitofp %21 : vector<16x1xi32> to vector<16x1xf32>
    %c15_i32 = arith.constant 15 : i32
    %23 = vector.broadcast %c15_i32 : i32 to vector<16x1xi32>
    %24 = arith.cmpi ne, %18, %23 : vector<16x1xi32>
    %25 = arith.extui %24 : vector<16x1xi1> to vector<16x1xi32>
    %26 = arith.sitofp %25 : vector<16x1xi32> to vector<16x1xf32>
    %c1_i32_6 = arith.constant 1 : i32
    %27 = tpu.dynamic_rotate %1 by %c1_i32_6 dim 0 : vector<16x128xf32>, i32 -> vector<16x128xf32>
    %28 = vector.broadcast %22 : vector<16x1xf32> to vector<16x128xf32>
    %29 = arith.mulf %27, %28 : vector<16x128xf32>
    %c15_i32_7 = arith.constant 15 : i32
    %30 = tpu.dynamic_rotate %1 by %c15_i32_7 dim 0 : vector<16x128xf32>, i32 -> vector<16x128xf32>
    %31 = vector.broadcast %26 : vector<16x1xf32> to vector<16x128xf32>
    %32 = arith.mulf %30, %31 : vector<16x128xf32>
    %33 = tpu.concatenate %29, %1, %32 in 1 : vector<16x128xf32>, vector<16x128xf32>, vector<16x128xf32> -> vector<16x384xf32>
    %34 = arith.truncf %33 : vector<16x384xf32> to vector<16x384xbf16>
    %c0_8 = arith.constant 0 : index
    %c0_9 = arith.constant 0 : index
    %35 = vector.load %arg2[%c0_8, %c0_9] : memref<384x128xbf16, #tpu.memory_space<vmem>>, vector<384x128xbf16>
    %cst = arith.constant dense<0.000000e+00> : vector<16x128xf32>
    %36 = tpu.matmul %34, %35, %cst {dimension_numbers = #tpu.dot_dimension_numbers<[1], [0], [0], [1], [0, 0, 1, 1], [], []>} : vector<16x384xbf16>, vector<384x128xbf16>, vector<16x128xf32> -> vector<16x128xf32>
    %c0_10 = arith.constant 0 : index
    %c0_11 = arith.constant 0 : index
    %37 = vector.load %arg3[%c0_10, %c0_11] : memref<1x128xf32, #tpu.memory_space<vmem>>, vector<1x128xf32>
    %38 = vector.broadcast %37 : vector<1x128xf32> to vector<16x128xf32>
    %39 = arith.addf %36, %38 : vector<16x128xf32>
    %cst_12 = arith.constant 0.000000e+00 : f32
    %40 = vector.broadcast %cst_12 : f32 to vector<16x128xf32>
    %41 = arith.maximumf %39, %40 : vector<16x128xf32>
    %c1_i32_13 = arith.constant 1 : i32
    %42 = tpu.dynamic_rotate %41 by %c1_i32_13 dim 0 : vector<16x128xf32>, i32 -> vector<16x128xf32>
    %43 = vector.broadcast %22 : vector<16x1xf32> to vector<16x128xf32>
    %44 = arith.mulf %42, %43 : vector<16x128xf32>
    %c15_i32_14 = arith.constant 15 : i32
    %45 = tpu.dynamic_rotate %41 by %c15_i32_14 dim 0 : vector<16x128xf32>, i32 -> vector<16x128xf32>
    %46 = vector.broadcast %26 : vector<16x1xf32> to vector<16x128xf32>
    %47 = arith.mulf %45, %46 : vector<16x128xf32>
    %48 = tpu.concatenate %44, %41, %47 in 1 : vector<16x128xf32>, vector<16x128xf32>, vector<16x128xf32> -> vector<16x384xf32>
    %49 = arith.truncf %48 : vector<16x384xf32> to vector<16x384xbf16>
    %c0_15 = arith.constant 0 : index
    %c0_16 = arith.constant 0 : index
    %50 = vector.load %arg4[%c0_15, %c0_16] : memref<384x128xbf16, #tpu.memory_space<vmem>>, vector<384x128xbf16>
    %cst_17 = arith.constant dense<0.000000e+00> : vector<16x128xf32>
    %51 = tpu.matmul %49, %50, %cst_17 {dimension_numbers = #tpu.dot_dimension_numbers<[1], [0], [0], [1], [0, 0, 1, 1], [], []>} : vector<16x384xbf16>, vector<384x128xbf16>, vector<16x128xf32> -> vector<16x128xf32>
    %c0_18 = arith.constant 0 : index
    %c0_19 = arith.constant 0 : index
    %52 = vector.load %arg5[%c0_18, %c0_19] : memref<1x128xf32, #tpu.memory_space<vmem>>, vector<1x128xf32>
    %53 = vector.broadcast %52 : vector<1x128xf32> to vector<16x128xf32>
    %54 = arith.addf %51, %53 : vector<16x128xf32>
    %55 = arith.addf %54, %1 : vector<16x128xf32>
    %cst_20 = arith.constant 0.000000e+00 : f32
    %56 = vector.broadcast %cst_20 : f32 to vector<16x128xf32>
    %57 = arith.maximumf %55, %56 : vector<16x128xf32>
    %58 = vector.shape_cast %57 : vector<16x128xf32> to vector<1x16x128xf32>
    %c0_21 = arith.constant 0 : index
    %c0_22 = arith.constant 0 : index
    %c0_23 = arith.constant 0 : index
    %59 = vector.load %arg6[%c0_21, %c0_22, %c0_23] : memref<1x16x128xf32, #tpu.memory_space<vmem>>, vector<1x16x128xf32>
    tpu.vector_store %arg6[%c0_21, %c0_22, %c0_23], %58 {strides = array<i32>} : memref<1x16x128xf32, #tpu.memory_space<vmem>>, vector<1x16x128xf32>,
    return
  }
  func.func @transform_0(%arg0: i32) -> (i32, i32, i32) {
    %c0_i32 = arith.constant 0 : i32
    %c0_i32_0 = arith.constant 0 : i32
    %c0_i32_1 = arith.constant 0 : i32
    return %arg0, %c0_i32, %c0_i32_0 : i32, i32, i32
  }
  func.func @transform_1(%arg0: i32) -> (i32, i32) {
    %c0_i32 = arith.constant 0 : i32
    %c0_i32_0 = arith.constant 0 : i32
    %c0_i32_1 = arith.constant 0 : i32
    return %c0_i32, %c0_i32_0 : i32, i32
  }
  func.func @transform_2(%arg0: i32) -> (i32, i32) {
    %c0_i32 = arith.constant 0 : i32
    %c0_i32_0 = arith.constant 0 : i32
    %c0_i32_1 = arith.constant 0 : i32
    return %c0_i32, %c0_i32_0 : i32, i32
  }
  func.func @transform_3(%arg0: i32) -> (i32, i32) {
    %c0_i32 = arith.constant 0 : i32
    %c0_i32_0 = arith.constant 0 : i32
    %c0_i32_1 = arith.constant 0 : i32
    return %c0_i32, %c0_i32_0 : i32, i32
  }
  func.func @transform_4(%arg0: i32) -> (i32, i32) {
    %c0_i32 = arith.constant 0 : i32
    %c0_i32_0 = arith.constant 0 : i32
    %c0_i32_1 = arith.constant 0 : i32
    return %c0_i32, %c0_i32_0 : i32, i32
  }
  func.func @transform_5(%arg0: i32) -> (i32, i32, i32) {
    %c0_i32 = arith.constant 0 : i32
    %c0_i32_0 = arith.constant 0 : i32
    %c0_i32_1 = arith.constant 0 : i32
    return %arg0, %c0_i32, %c0_i32_0 : i32, i32, i32
  }
}

</mosaic_0001>

<bundles_post_ra>
// kernel: tpu_custom_call.1
= control target key start
LH: loop header
LB: loop body
LE: loop exit
PB: predicated region body
PF: predicated region fallthrough
CT: control target
= control target key end

     0   :  { %10 = vsyncpa [#allocation3], 0  ;;  %s1831_s0 = inlined_call_operand.hbm [shape: f32[2,16,128], index: 0, kind: input, shape index: {}]   ;;  %s1832_s1 = inlined_call_operand.hbm [shape: bf16[384,128], index: 1, kind: input, shape index: {}]   ;;  %s1833_s2 = inlined_call_operand.vmem [shape: f32[1,128], index: 2, kind: input, shape index: {}]   ;;  %s1834_s3 = inlined_call_operand.hbm [shape: bf16[384,128], index: 3, kind: input, shape index: {}]   ;;  %s1835_s4 = inlined_call_operand.vmem [shape: f32[1,128], index: 4, kind: input, shape index: {}]   ;;  %s1836_s5 = inlined_call_operand.hbm [shape: f32[2,16,128], index: 5, kind: output, shape index: {}]  }
   0x1   :  { %12 = vsyncpa [#allocation3 + $0x1], 0 }
   0x2   :  { %13 = vsyncpa [#allocation6], 0 }
   0x3   :  { %14 = vsyncpa [#allocation4], 0 }
   0x4   :  { %16 = vsyncpa [#allocation4 + $0x1], 0  ;;  %s1519_s18 = smov 0   ;;  %s1521_s19 = smov 0  }
   0x5   :  { %s1523_s20 = smov 0   ;;  %s1525_s21 = smov 0  }
   0x6 LB: > { %s1540_s22 = sadd.s32 4294967295, %s1475_s21   ;;  %s1022_s23 = sadd.s32 4294967294, %s1475_s21   ;;  %s1475_s21 = sphi %s1525_s21, %s1856_s21   ;;  %s1471_s20 = sphi %s1523_s20, %s1855_s20   ;;  %s1467_s19 = sphi %s1521_s19, %s1854_s19   ;;  %s1463_s18 = sphi %s1519_s18, %s1853_s18  }
   0x7   : > { %p42_p0 = scmp.ne.s32.totalorder %s1467_s19, %s1463_s18  ;;  %p1837_p1 = scmp.eq.s32.totalorder %s1540_s22, 0 }
   0x8   : > { %p156_p3 = scmp.eq.s32.totalorder %s1022_s23, 1  ;;  %p1023_p5 = scmp.ge.s32.totalorder %s1475_s21, 1 }
   0x9   : > { %p1549_p4 = por %p1837_p1, %p42_p0  ;;  %p163_p7 = scmp.lt.s32.totalorder %s1475_s21, 3 }
   0xa   : > { %p1554_p6 = por %p156_p3, %p42_p0  ;;  %s1477_s27 = smov [#allocation5]  }
   0xb   : > { %s1840_s24 = scalar_select %p1549_p4, 1, 0 }
   0xc   : > { %s1841_s25 = scalar_select %p1554_p6, 1, 0 }
   0xd   : > { %p1559_p8 = pnand %p1023_p5, %p163_p7  ;;  %s175_s28 = sshll.u32 %s1477_s27, 4  ;;  %s1563_s28 = int_to_ptr.vmem [resolvable:$true] %s175_s28 }
   0xe   : > { %s1478_s30 = smov [#allocation7]   ;;  %s1319_s9 = scalar_lea.hbm %s1832_s1, 3072 }
   0xf   : > { %p1208_p9 = pneg %p1559_p8  ;;  %s191_s6 = sshll.u32 %s1478_s30, 4  ;;  %s1574_s6 = int_to_ptr.vmem [resolvable:$true] %s191_s6 }
  0x10   : > { %p1320_p12 = scmp.ne.s32.totalorder %s1832_s1, %s1319_s9  ;;  %p1326_p5 = scmp.lt.u32.totalorder %s1319_s9, %s1832_s1 }
  0x11   : > { %p1570_p11 = pnand %p1208_p9, %p1837_p1 }
  0x13   : > { %p1321_p13 = pneg %p1570_p11 }
  0x15   : > { %p1322_p0 = pnand %p1321_p13, %p1320_p12 }
  0x17   : > { %p1323_p3 = pneg %p1322_p0 }
  0x19   : > { %p1328_p7 = pnand %p1326_p5, %p1323_p3 }
  0x1b   : > { %1331 = shalt.err (!%p1328_p7)
}
  0x1c   : > { %s1332_s14 = scalar_lea.vmem %s1563_s28, 3072  ;;  %p1340_p2 = scmp.lt.s32.totalorder %s1563_s28, %s1563_s28 }
  0x1d   : > { %p1333_p9 = scmp.ne.s32.totalorder %s1563_s28, %s1332_s14  ;;  %p1341_p12 = scmp.lt.s32.totalorder %s1332_s14, %s1332_s14 }
  0x1f   : > { %p1335_p10 = pnand %p1333_p9, %p1321_p13  ;;  %p1342_p0 = por %p1341_p12, %p1340_p2 }
  0x21   : > { %p1336_p1 = pneg %p1335_p10 }
  0x23   : > { %p1343_p6 = pnand %p1342_p0, %p1336_p1 }
  0x25   : > { %1346 = shalt.err (!%p1343_p6)
}
  0x26   : > { %s1479_s15 = smov 64   ;;  %s1480_s16 = smov 4  }
  0x27   : > { %1211 = dma.hbm_to_vmem [thread:$0]  (!%p1570_p11), %s1832_s1, 3072, %s1563_s28, [#allocation6], %s1479_s15, %s1479_s15, %s1480_s16  }
  0x28   : > { %s1347_s7 = scalar_lea.hbm %s1834_s3, 3072 }
  0x29   : > { %p1348_p2 = scmp.ne.s32.totalorder %s1834_s3, %s1347_s7  ;;  %p1354_p10 = scmp.lt.u32.totalorder %s1347_s7, %s1834_s3 }
  0x2b   : > { %p1350_p1 = pnand %p1348_p2, %p1321_p13 }
  0x2d   : > { %p1351_p6 = pneg %p1350_p1 }
  0x2f   : > { %p1356_p3 = pnand %p1354_p10, %p1351_p6 }
  0x31   : > { %1359 = shalt.err (!%p1356_p3)
}
  0x32   : > { %s1360_s28 = scalar_lea.vmem %s1574_s6, 3072  ;;  %p1368_p12 = scmp.lt.s32.totalorder %s1574_s6, %s1574_s6 }
  0x33   : > { %p1361_p5 = scmp.ne.s32.totalorder %s1574_s6, %s1360_s28  ;;  %p1369_p0 = scmp.lt.s32.totalorder %s1360_s28, %s1360_s28 }
  0x35   : > { %p1363_p7 = pnand %p1361_p5, %p1321_p13  ;;  %p1370_p2 = por %p1369_p0, %p1368_p12 }
  0x37   : > { %p1364_p9 = pneg %p1363_p7 }
  0x39   : > { %p1371_p1 = pnand %p1370_p2, %p1364_p9 }
  0x3b   : > { %1374 = shalt.err (!%p1371_p1)
}
  0x3c   : > { %1214 = dma.hbm_to_vmem [thread:$0]  (!%p1570_p11), %s1834_s3, 3072, %s1574_s6, [#allocation6], %s1479_s15, %s1479_s15, %s1480_s16  }
  0x3d   : > { %s1629_s14 = sadd.s32 1, %s1475_s21   ;;  %s29_s29 = sadd.s32 1, %s1471_s20 }
  0x3e   : > { %s26_s17 = ssub.s32 %s1475_s21, %s1629_s14  ;;  %p36_p13 = scmp.ne.s32.totalorder %s1471_s20, %s1467_s19 }
  0x3f   : > { %p27_p6 = scmp.eq.s32.totalorder %s26_s17, 0  ;;  %p37_p10 = scmp.eq.s32.totalorder %s1475_s21, 0 }
  0x40   : > { %p1844_p3 = scmp.eq.s32.totalorder %s1540_s22, 1  ;;  %p1225_p7 = scmp.lt.s32.totalorder %s1475_s21, 2 }
  0x41   : > { %s1645_s27 = scalar_select %p27_p6, %s1471_s20, %s29_s29  }
  0x42   : > { %p1639_p5 = por %p1844_p3, %p36_p13  ;;  %p38_p9 = por %p37_p10, %p36_p13 }
  0x43   : > { %s208_s30 = sand.u32 1, %s1471_s20   ;;  %s1092_s6 = sshll.u32 %s1475_s21, 8 }
  0x44   : > { %s1845_s23 = scalar_select %p1639_p5, 1, 0 }
  0x45   : > { %s1027_s7 = sshll.u32 %s208_s30, 4  ;;  %s1652_s8 = scalar_lea.hbm %s1831_s0, %s1092_s6 }
  0x46   : > { %s212_s9 = scalar_lea.vmem [#allocation2], %s1027_s7  ;;  %p1656_p11 = pnand %p1225_p7, %p38_p9 }
  0x47   : > { %s219_s10 = sshll.u32 %s212_s9, 4  ;;  %s1660_s28 = scalar_lea.sflag [#allocation3], %s208_s30  ;;  %s1654_s10 = int_to_ptr.vmem [resolvable:$true] %s219_s10 }
  0x48   : > { %s1375_s12 = scalar_lea.hbm %s1652_s8, 256  ;;  %p1377_p0 = pneg %p1656_p11 }
  0x49   : > { %p1376_p12 = scmp.ne.s32.totalorder %s1652_s8, %s1375_s12  ;;  %s1380_s17 = scalar_lea.hbm %s1831_s0, 512 }
  0x4a   : > { %p1381_p13 = scmp.lt.u32.totalorder %s1652_s8, %s1831_s0  ;;  %p1382_p6 = scmp.lt.u32.totalorder %s1380_s17, %s1375_s12 }
  0x4b   : > { %p1378_p2 = pnand %p1377_p0, %p1376_p12  ;;  %p1384_p3 = scmp.lt.u32.totalorder %s1375_s12, %s1652_s8 }
  0x4c   : > { %p1383_p10 = por %p1382_p6, %p1381_p13 }
  0x4d   : > { %p1379_p1 = pneg %p1378_p2 }
  0x4e   : > { %p1385_p7 = por %p1384_p3, %p1383_p10 }
  0x50   : > { %p1386_p9 = pnand %p1385_p7, %p1379_p1 }
  0x52   : > { %1389 = shalt.err (!%p1386_p9)
}
  0x53   : > { %s1390_s30 = scalar_lea.vmem %s1654_s10, 256  ;;  %s1481_s15 = smov [#allocation2]  }
  0x54   : > { %p1391_p12 = scmp.ne.s32.totalorder %s1654_s10, %s1390_s30  ;;  %s1395_s16 = sshll.u32 %s1481_s15, 4  ;;  %s1396_s16 = int_to_ptr.vmem [resolvable:$false] %s1395_s16 }
  0x55   : > { %s1397_s9 = scalar_lea.vmem %s1396_s16, 512  ;;  %p1398_p4 = scmp.lt.s32.totalorder %s1654_s10, %s1396_s16 }
  0x56   : > { %p1393_p2 = pnand %p1391_p12, %p1377_p0  ;;  %p1399_p13 = scmp.lt.s32.totalorder %s1397_s9, %s1390_s30 }
  0x58   : > { %p1394_p5 = pneg %p1393_p2  ;;  %p1400_p6 = por %p1399_p13, %p1398_p4 }
  0x5a   : > { %p1401_p10 = pnand %p1400_p6, %p1394_p5 }
  0x5c   : > { %1404 = shalt.err (!%p1401_p10)
}
  0x5d   : > { %s1482_s12 = smov 128   ;;  %s1483_s13 = smov 8  }
  0x5e   : > { %1218 = dma.hbm_to_vmem [thread:$0]  (!%p1656_p11), %s1652_s8, 256, %s1654_s10, %s1660_s28, %s1482_s12, %s1482_s12, %s1483_s13  }
  0x5f   : > { %231 = sbr.rel (%p1559_p8) target bundleno = 610 (0x262), region = 40  ;;  %s1691_s29 = sand.u32 (!%p1559_p8), 1, %s1467_s19  }
  0x60   : > { %s1031_s17 = sshll.u32 (!%p1559_p8), %s1691_s29, 4  ;;  %s234_s7 = scalar_lea.sflag (!%p1559_p8), [#allocation3], %s1691_s29 }
  0x61   : > { %s1697_s6 = scalar_lea.vmem (!%p1559_p8), [#allocation2], %s1031_s17  ;;  %p1847_p4 = scmp.ne.s32.totalorder (!%p1559_p8), %s1840_s24, 0 }
  0x66   : > { %1450 = dma.done.wait (%p1847_p4), %s234_s7, 256  }
  0x67   : > { %1452 = vsyncadd (%p1847_p4), %s234_s7, 4294967040  ;;  %p1848_p5 = scmp.eq.s32.totalorder %s1540_s22, 0 }
  0x69   : > { %1454 = dma.done.wait (%p1848_p5), [#allocation6], 6144   ;;  %p1849_p8 = pmov %p1848_p5 }
  0x6a   : > { %v1484_v0 = vmov 0.0   ;;  %vm1485_vm0 = vmmov 0   ;;  %v1271_v1 = vld [vmem:[#allocation5 + $0x40] sm:$0xff]   ;;  %v1274_v4 = vld [vmem:[#allocation5 + $0x48] sm:$0xff]   ;;  %v275_v6 = vlaneseq  ;;  %v1277_v8 = vld [vmem:[#allocation5 + $0x50] sm:$0xff]   ;;  %s1093_s11 = sshll.u32 %s1540_s22, 8 }
  0x6b   : > { %1456 = vsyncadd (%p1849_p8), [#allocation6], 4294961152  ;;  %1156 = vmatprep.subr.bf16.mxu1 %v1484_v0  ;;  %1172 = vmatprep.mubr.msk.bf16.mxu1 %vm1485_vm0, %v1484_v0  ;;  %v1272_v2 = vld [vmem:[#allocation5] sm:$0xff]   ;;  %v1275_v5 = vld [vmem:[#allocation5 + $0x8] sm:$0xff]   ;;  %s271_s28 = scalar_lea.vmem [#allocation8], %s1031_s17  ;;  %s1785_s9 = scalar_lea.hbm %s1836_s5, %s1093_s11 }
  0x6c   : > { %1094 = vmatprep.subr.bf16.mxu0 %v1271_v1  ;;  %v1273_v3 = vld [vmem:[#allocation5 + $0x80] sm:$0xff]   ;;  %v1276_v7 = vld [vmem:[#allocation5 + $0x88] sm:$0xff]   ;;  %v1278_v9 = vld [vmem:[#allocation5 + $0x10] sm:$0xff]   ;;  %v1711_v11 = vshrl.u32 %v275_v6, 7  ;;  %s930_s30 = sshll.u32 %s271_s28, 4  ;;  %s917_s22 = scalar_lea.sflag [#allocation4], %s1691_s29  ;;  %s1787_s30 = int_to_ptr.vmem [resolvable:$true] %s930_s30 }
  0x6d   : > { %1095 = vmatpush3.bf16.msra.mxu0 %v1272_v2  ;;  %1157 = vmatpush3.bf16.msra.mxu1 %v1273_v3  ;;  %v1279_v10 = vld [vmem:[#allocation5 + $0x90] sm:$0xff]   ;;  %v1280_v12 = vld [vmem:[#allocation5 + $0x58] sm:$0xff]   ;;  %v1283_v15 = vld [vmem:[#allocation5 + $0x60] sm:$0xff]   ;;  %s1405_s12 = scalar_lea.vmem %s1787_s30, 256  ;;  %p1850_p0 = scmp.ne.s32.totalorder %s1845_s23, 0 }
  0x6e   : > { %1096 = vmatprep.subr.bf16.mxu0 %v1274_v4  ;;  %1158 = vmatprep.subr.bf16.mxu1 %v1484_v0  ;;  %v1281_v13 = vld [vmem:[#allocation5 + $0x18] sm:$0xff]   ;;  %v277_v16 = vadd.s32 8, %v1711_v11  ;;  %v1284_v17 = vld [vmem:[#allocation5 + $0x20] sm:$0xff]   ;;  %v282_v19 = vand.u32 15, %v1711_v11  ;;  %v1286_v20 = vld [vmem:[#allocation5 + $0x68] sm:$0xff]   ;;  %vm316_vm3 = vcmp.lt.s32.totalorder %v1711_v11, 1  ;;  %p1406_p11 = scmp.ne.s32.totalorder %s1787_s30, %s1405_s12 }
  0x6f   : > { %v1282_v14 = vld [vmem:[#allocation5 + $0x98] sm:$0xff]   ;;  %v1285_v18 = vld [vmem:[#allocation5 + $0xa0] sm:$0xff]   ;;  %v1287_v22 = vld [vmem:[#allocation5 + $0x28] sm:$0xff]   ;;  %vm323_vm4 = vcmp.lt.s32.totalorder %v1711_v11, 7  ;;  %s1486_s13 = smov [#allocation8]  }
  0x70   : > { %v289_v21 = vand.u32 15, %v277_v16  ;;  %v1288_v23 = vld [vmem:[#allocation5 + $0xa8] sm:$0xff]   ;;  %vm302_vm1 = vcmp.ne.s32.totalorder %v282_v19, 0  ;;  %v1289_v24 = vld [vmem:[#allocation5 + $0x70] sm:$0xff]   ;;  %v1292_v27 = vld [vmem:[#allocation5 + $0x78] sm:$0xff]   ;;  %p1407_p1 = pnand %p1406_p11, %p1850_p0  ;;  %s1409_s17 = sshll.u32 %s1486_s13, 4  ;;  %s1410_s17 = int_to_ptr.vmem [resolvable:$false] %s1409_s17 }
  0x71   : > { %1097 = vmatpush3.bf16.msra.mxu0 %v1275_v5  ;;  %1159 = vmatpush3.bf16.msra.mxu1 %v1276_v7  ;;  %v1290_v25 = vld [vmem:[#allocation5 + $0x30] sm:$0xff]   ;;  %v1725_v29 = vld [vmem:[%s1697_s6 + $0x8] sm:$0xff]  ;;  %v1728_v30 = vsel %vm302_vm1, 1.0, %v1484_v0  ;;  %v1295_v45 = vld [vmem:[#allocation7 + $0x40] sm:$0xff]   ;;  %s1411_s7 = scalar_lea.vmem %s1410_s17, 512  ;;  %p1412_p7 = scmp.lt.s32.totalorder %s1787_s30, %s1410_s17 }
  0x72   : > { %1098 = vmatprep.subr.bf16.mxu0 %v1277_v8  ;;  %1160 = vmatprep.subr.bf16.mxu1 %v1484_v0  ;;  %vm309_vm2 = vcmp.ne.s32.totalorder %v289_v21, 15  ;;  %v1291_v26 = vld [vmem:[#allocation5 + $0xb0] sm:$0xff]   ;;  %v315_v33 = vrot.slane %v1725_v29, 7  ;;  %v322_v35 = vrot.slane %v1725_v29, 1  ;;  %v1293_v37 = vld [vmem:[#allocation5 + $0x38] sm:$0xff]   ;;  %v1296_v47 = vld [vmem:[#allocation7] sm:$0xff]   ;;  %p1408_p3 = pneg %p1407_p1  ;;  %p1413_p9 = scmp.lt.s32.totalorder %s1411_s7, %s1405_s12 }
  0x73   : > { %v1722_v28 = vld [vmem:[%s1697_s6] sm:$0xff]  ;;  %v1731_v31 = vsel %vm309_vm2, 1.0, %v1484_v0  ;;  %v1294_v40 = vld [vmem:[#allocation5 + $0xb8] sm:$0xff]   ;;  %v1298_v50 = vld [vmem:[#allocation7 + $0x48] sm:$0xff]  }
  0x74   : > { %v314_v32 = vrot.slane %v1722_v28, 7  ;;  %v321_v34 = vrot.slane %v1722_v28, 1  ;;  %v329_v36 = vpack.c.bf16 %v1725_v29, %v1722_v28  ;;  %v1297_v49 = vld [vmem:[#allocation7 + $0x80] sm:$0xff]   ;;  %v1299_v51 = vld [vmem:[#allocation7 + $0x8] sm:$0xff]   ;;  %v1301_v53 = vld [vmem:[#allocation7 + $0x50] sm:$0xff]   ;;  %p1414_p12 = por %p1413_p9, %p1412_p7 }
  0x75   : > { %1099 = vmatpush3.bf16.msra.mxu0 %v1278_v9  ;;  %1161 = vmatpush3.bf16.msra.mxu1 %v1279_v10  ;;  %v1300_v52 = vld [vmem:[#allocation7 + $0x88] sm:$0xff]   ;;  %v1302_v54 = vld [vmem:[#allocation7 + $0x10] sm:$0xff]   ;;  %v1304_v56 = vld [vmem:[#allocation7 + $0x58] sm:$0xff]  }
  0x76   : > { %1100 = vmatprep.subr.bf16.mxu0 %v1280_v12  ;;  %1162 = vmatprep.subr.bf16.mxu1 %v1484_v0  ;;  %v318_v38 = vsel %vm316_vm3, %v315_v33, %v314_v32  ;;  %v325_v39 = vsel %vm323_vm4, %v322_v35, %v321_v34  ;;  %v317_v41 = vsel %vm316_vm3, %v314_v32, %v315_v33  ;;  %v1303_v55 = vld [vmem:[#allocation7 + $0x90] sm:$0xff]   ;;  %v1305_v57 = vld [vmem:[#allocation7 + $0x18] sm:$0xff]   ;;  %v1307_v59 = vld [vmem:[#allocation7 + $0x60] sm:$0xff]   ;;  %p1415_p2 = pnand %p1414_p12, %p1408_p3 }
  0x77   : > { %562 = vmatprep.mubr.bf16.mxu0 %v329_v36  ;;  %v319_v42 = vmul.f32 %v1728_v30, %v318_v38  ;;  %v327_v43 = vmul.f32 %v1731_v31, %v325_v39  ;;  %v324_v44 = vsel %vm323_vm4, %v321_v34, %v322_v35  ;;  %v1306_v58 = vld [vmem:[#allocation7 + $0x98] sm:$0xff]   ;;  %v1308_v60 = vld [vmem:[#allocation7 + $0x20] sm:$0xff]   ;;  %v1310_v62 = vld [vmem:[#allocation7 + $0x68] sm:$0xff]  }
  0x78   : > { %v1309_v61 = vld [vmem:[#allocation7 + $0xa0] sm:$0xff]   ;;  %v1311_v63 = vld [vmem:[#allocation7 + $0x28] sm:$0xff]   ;;  %v1313_v2 = vld [vmem:[#allocation7 + $0x70] sm:$0xff]  }
  0x79   : > { %1101 = vmatpush3.bf16.msra.mxu0 %v1281_v13  ;;  %1163 = vmatpush3.bf16.msra.mxu1 %v1282_v14  ;;  %v328_v46 = vpack.c.bf16 %v317_v41, %v319_v42  ;;  %v330_v48 = vpack.c.bf16 %v327_v43, %v324_v44  ;;  %v1312_v1 = vld [vmem:[#allocation7 + $0xa8] sm:$0xff]   ;;  %v1314_v3 = vld [vmem:[#allocation7 + $0x30] sm:$0xff]   ;;  %v1316_v5 = vld [vmem:[#allocation7 + $0x78] sm:$0xff]  }
  0x7a   : > { %1102 = vmatprep.subr.bf16.mxu0 %v1283_v15  ;;  %1164 = vmatprep.subr.bf16.mxu1 %v1484_v0  ;;  %v1315_v4 = vld [vmem:[#allocation7 + $0xb0] sm:$0xff]   ;;  %v1317_v6 = vld [vmem:[#allocation7 + $0x38] sm:$0xff]   ;;  %v1037_v10 = vld [vmem:[%s1833_s2] ss:$0 sm:$0xff] }
  0x7b   : > { %v1318_v7 = vld [vmem:[#allocation7 + $0xb8] sm:$0xff]   ;;  %v1062_v44 = vld [vmem:[%s1835_s4] ss:$0 sm:$0xff] }
  0x7d   : > { %1103 = vmatpush3.bf16.msra.mxu0 %v1284_v17  ;;  %1165 = vmatpush3.bf16.msra.mxu1 %v1285_v18 }
  0x7e   : > { %1104 = vmatprep.subr.bf16.mxu0 %v1286_v20  ;;  %1166 = vmatprep.subr.bf16.mxu1 %v1484_v0 }
  0x81   : > { %1105 = vmatpush3.bf16.msra.mxu0 %v1287_v22  ;;  %1167 = vmatpush3.bf16.msra.mxu1 %v1288_v23 }
  0x82   : > { %1106 = vmatprep.subr.bf16.mxu0 %v1289_v24  ;;  %1168 = vmatprep.subr.bf16.mxu1 %v1484_v0 }
  0x85   : > { %1107 = vmatpush3.bf16.msra.mxu0 %v1290_v25  ;;  %1169 = vmatpush3.bf16.msra.mxu1 %v1291_v26 }
  0x86   : > { %1108 = vmatprep.subr.bf16.mxu0 %v1292_v27  ;;  %1170 = vmatprep.subr.bf16.mxu1 %v1484_v0 }
  0x89   : > { %1109 = vmatpush3.bf16.msra.mxu0 %v1293_v37  ;;  %1171 = vmatpush3.bf16.msra.mxu1 %v1294_v40 }
  0x8a   : > { %1125 = vmatprep.subr.bf16.mxu0 %v1295_v45  ;;  %1176 = vmatprep.subr.bf16.mxu1 %v1484_v0 }
  0x8c   : > { %563 = vmatmul.mubr.bf16.vlgmr.msra.gmra.mrb[0].mxu0 %v328_v46  ;;  %1173 = vmatmul.mubr.bf16.vlgmr.msra.gmra.mrb[0].mxu1 %v330_v48 }
  0x8d   : > { %1126 = vmatpush3.bf16.msra.mxu0 %v1296_v47  ;;  %1177 = vmatpush3.bf16.msra.mxu1 %v1297_v49 }
  0x8e   : > { %1127 = vmatprep.subr.bf16.mxu0 %v1298_v50  ;;  %1178 = vmatprep.subr.bf16.mxu1 %v1484_v0 }
  0x8f   : > { %1192 = vmatprep.mubr.msk.bf16.mxu1 %vm1485_vm0, %v1484_v0 }
  0x91   : > { %1128 = vmatpush3.bf16.msra.mxu0 %v1299_v51  ;;  %1179 = vmatpush3.bf16.msra.mxu1 %v1300_v52 }
  0x92   : > { %1129 = vmatprep.subr.bf16.mxu0 %v1301_v53  ;;  %1180 = vmatprep.subr.bf16.mxu1 %v1484_v0 }
  0x95   : > { %1130 = vmatpush3.bf16.msra.mxu0 %v1302_v54  ;;  %1181 = vmatpush3.bf16.msra.mxu1 %v1303_v55 }
  0x96   : > { %1131 = vmatprep.subr.bf16.mxu0 %v1304_v56  ;;  %1182 = vmatprep.subr.bf16.mxu1 %v1484_v0 }
  0x99   : > { %1132 = vmatpush3.bf16.msra.mxu0 %v1305_v57  ;;  %1183 = vmatpush3.bf16.msra.mxu1 %v1306_v58 }
  0x9a   : > { %1184 = vmatprep.subr.bf16.mxu1 %v1484_v0  ;;  %1133 = vmatprep.subr.bf16.mxu0 %v1307_v59 }
  0x9d   : > { %1134 = vmatpush3.bf16.msra.mxu0 %v1308_v60  ;;  %1185 = vmatpush3.bf16.msra.mxu1 %v1309_v61 }
  0x9e   : > { %1186 = vmatprep.subr.bf16.mxu1 %v1484_v0  ;;  %1135 = vmatprep.subr.bf16.mxu0 %v1310_v62 }
  0xa1   : > { %1136 = vmatpush3.bf16.msra.mxu0 %v1311_v63  ;;  %1187 = vmatpush3.bf16.msra.mxu1 %v1312_v1 }
  0xa2   : > { %1188 = vmatprep.subr.bf16.mxu1 %v1484_v0  ;;  %1137 = vmatprep.subr.bf16.mxu0 %v1313_v2 }
  0xa5   : > { %1138 = vmatpush3.bf16.msra.mxu0 %v1314_v3  ;;  %1189 = vmatpush3.bf16.msra.mxu1 %v1315_v4 }
  0xa6   : > { %1190 = vmatprep.subr.bf16.mxu1 %v1484_v0  ;;  %1139 = vmatprep.subr.bf16.mxu0 %v1316_v5 }
  0xa9   : > { %1140 = vmatpush3.bf16.msra.mxu0 %v1317_v6  ;;  %1191 = vmatpush3.bf16.msra.mxu1 %v1318_v7 }
 0x15f   : > { %v1110_v8 = vpop.f32.mrb[0].mxu0  ;;  %v605_v12 = vpop.f32.mrb[0].mxu1 }
 0x160   : > { %v1111_v9 = vpop.f32.mrb[1].mxu0  ;;  %v1174_v15 = vpop.f32.mrb[1].mxu1 }
 0x161   : > { %v1112_v13 = vadd.f32 %v1111_v9, %v1110_v8  ;;  %v1113_v14 = vpop.f32.mrb[2].mxu0  ;;  %v608_v17 = vpop.f32.mrb[2].mxu1 }
 0x162   : > { %v1114_v16 = vpop.f32.mrb[3].mxu0  ;;  %v1175_v0 = vpop.f32.mrb[3].mxu1 }
 0x163   : > { %v565_v18 = vadd.f32 %v1112_v13, %v1037_v10  ;;  %v1115_v19 = vadd.f32 %v1114_v16, %v1113_v14 }
 0x165   : > { %v606_v20 = vadd.f32 %v605_v12, %v565_v18  ;;  %v568_v21 = vadd.f32 %v1115_v19, %v1037_v10 }
 0x167   : > { %v612_v22 = vmax.f32 %v606_v20, 0.0  ;;  %v609_v23 = vadd.f32 %v608_v17, %v568_v21 }
 0x169   : > { %v613_v24 = vmax.f32 %v609_v23, 0.0  ;;  %v614_v25 = vrot.slane %v612_v22, 7  ;;  %v620_v26 = vrot.slane %v612_v22, 1 }
 0x16b   : > { %v615_v27 = vrot.slane %v613_v24, 7  ;;  %v621_v32 = vrot.slane %v613_v24, 1  ;;  %v627_v33 = vpack.c.bf16 %v613_v24, %v612_v22 }
 0x16d   : > { %v617_v34 = vsel %vm316_vm3, %v615_v27, %v614_v25  ;;  %v623_v35 = vsel %vm323_vm4, %v621_v32, %v620_v26  ;;  %860 = vmatprep.mubr.bf16.mxu0 %v627_v33  ;;  %v616_v36 = vsel %vm316_vm3, %v614_v25, %v615_v27  ;;  %v622_v37 = vsel %vm323_vm4, %v620_v26, %v621_v32 }
 0x16e   : > { %v618_v38 = vmul.f32 %v1728_v30, %v617_v34  ;;  %v625_v39 = vmul.f32 %v1731_v31, %v623_v35 }
 0x170   : > { %v626_v40 = vpack.c.bf16 %v616_v36, %v618_v38  ;;  %v628_v41 = vpack.c.bf16 %v625_v39, %v622_v37 }
 0x172   : > { %861 = vmatmul.mubr.bf16.vlgmr.msra.gmra.mrb[4].mxu0 %v626_v40  ;;  %1193 = vmatmul.mubr.bf16.vlgmr.msra.gmra.mrb[4].mxu1 %v628_v41 }
 0x245   : > { %v1141_v42 = vpop.f32.mrb[4].mxu0  ;;  %v903_v43 = vpop.f32.mrb[4].mxu1 }
 0x246   : > { %v1142_v45 = vpop.f32.mrb[5].mxu0  ;;  %v1194_v46 = vpop.f32.mrb[5].mxu1 }
 0x247   : > { %v1143_v11 = vadd.f32 %v1142_v45, %v1141_v42  ;;  %v1144_v47 = vpop.f32.mrb[6].mxu0  ;;  %v906_v48 = vpop.f32.mrb[6].mxu1 }
 0x248   : > { %v1145_v30 = vpop.f32.mrb[7].mxu0  ;;  %v1195_v49 = vpop.f32.mrb[7].mxu1 }
 0x249   : > { %v863_v31 = vadd.f32 %v1143_v11, %v1062_v44  ;;  %v1146_v50 = vadd.f32 %v1145_v30, %v1144_v47 }
 0x24b   : > { %v904_v51 = vadd.f32 %v903_v43, %v863_v31  ;;  %v866_v52 = vadd.f32 %v1146_v50, %v1062_v44 }
 0x24d   : > { %v910_v53 = vadd.f32 %v904_v51, %v1722_v28  ;;  %v907_v54 = vadd.f32 %v906_v48, %v866_v52 }
 0x24f   : > { %v912_v55 = vmax.f32 %v910_v53, 0.0  ;;  %v911_v56 = vadd.f32 %v907_v54, %v1725_v29 }
 0x251   : > { %914 = vst [vmem:[%s271_s28] sm:$0xff] %v912_v55  ;;  %v913_v28 = vmax.f32 %v911_v56, 0.0 }
 0x253   : > { %915 = vst [vmem:[%s271_s28 + $0x8] sm:$0xff] %v913_v28 }
 0x254   : > { %1418 = shalt.err (!%p1415_p2)
}
 0x255   : > { %s1419_s6 = scalar_lea.hbm %s1785_s9, 256  ;;  %s1423_s8 = scalar_lea.hbm %s1836_s5, 512 }
 0x256   : > { %p1420_p13 = scmp.ne.s32.totalorder %s1785_s9, %s1419_s6  ;;  %p1424_p4 = scmp.lt.u32.totalorder %s1785_s9, %s1836_s5 }
 0x257   : > { %p1425_p5 = scmp.lt.u32.totalorder %s1423_s8, %s1419_s6  ;;  %p1427_p11 = scmp.lt.u32.totalorder %s1419_s6, %s1785_s9 }
 0x258   : > { %p1421_p6 = pnand %p1420_p13, %p1850_p0 }
 0x259   : > { %p1426_p8 = por %p1425_p5, %p1424_p4 }
 0x25a   : > { %p1422_p10 = pneg %p1421_p6 }
 0x25b   : > { %p1428_p1 = por %p1427_p11, %p1426_p8 }
 0x25d   : > { %p1429_p3 = pnand %p1428_p1, %p1422_p10 }
 0x25f   : > { %1432 = shalt.err (!%p1429_p3)
}
 0x260   : > { %s1487_s28 = smov 128   ;;  %s1488_s15 = smov 8  }
 0x261   : > { %1206 = dma.vmem_to_hbm [thread:$0]  (%p1850_p0), %s1787_s30, 256, %s1785_s9, %s917_s22, %s1487_s28, %s1487_s28, %s1488_s15  }
 0x262 PF: > { %s945_s16 = sand.u32 1, %s1463_s18   ;;  %p1851_p7 = scmp.ne.s32.totalorder %s1841_s25, 0 }
 0x263   : > { %p1852_p9 = scmp.ge.s32.totalorder %s1475_s21, 2  ;;  %s946_s12 = scalar_lea.sflag [#allocation4], %s945_s16 }
 0x265   : > { %p1220_p12 = pnand %p1852_p9, %p1851_p7 }
 0x267   : > { %1458 = dma.done.wait (!%p1220_p12), %s946_s12, 256  }
 0x268   : > { %1460 = vsyncadd (!%p1220_p12), %s946_s12, 4294967040  ;;  %p19_p2 = scmp.ge.s32.totalorder %s1629_s14, 4   ;;  %s1853_s18 = smov %s1467_s19 }
 0x269   : > { %s1854_s19 = smov %s1471_s20  ;;  %s1855_s20 = smov %s1645_s27 }
 0x26a   : > { %s1856_s21 = smov %s1629_s14  ;;  %21 = sbr.rel (!%p19_p2) target bundleno = 6 (0x6), region = 93 }
 0x271   :  { %951 = vsyncpa [#allocation3], 1 }
 0x272   :  { %953 = vsyncpa [#allocation3 + $0x1], 1 }
 0x273   :  { %954 = vsyncpa [#allocation6], 1 }
 0x274   :  { %955 = vsyncpa [#allocation4], 1 }
 0x275   :  { %957 = vsyncpa [#allocation4 + $0x1], 1 }

</bundles_post_ra>
